<compile_context>
chip_gen: v6e
topology: v6e:2x2x1
jax: 0.10.0
libtpu: 0.0.40
codegen_flags: <defaults>
</compile_context>

<pallas_src>
import jax
import jax.numpy as jnp
from jax.experimental import pallas as pl
from jax.experimental.pallas import tpu as pltpu

HIDDEN = 256


def mlp_kernel(x_ref, w1_ref, b1_ref, w2_ref, b2_ref, w3_ref, b3_ref, o_ref):
    # fc1 + relu  (bf16 operands, f32 accumulation)
    x = x_ref[...].astype(jnp.bfloat16)
    h = jnp.dot(x, w1_ref[...], preferred_element_type=jnp.float32)
    h = jnp.maximum(h + b1_ref[...], 0.0)

    # fc2 + relu
    h = jnp.dot(h.astype(jnp.bfloat16), w2_ref[...],
                preferred_element_type=jnp.float32)
    h = jnp.maximum(h + b2_ref[...], 0.0)

    # dropout(0.5) == identity in eval mode (see TODO above)

    # fc3: 256 -> 1 as elementwise mul + lane reduction (rides VPU/XLU slots,
    # keeps the MXU free and writes only the real output column).
    s = jnp.sum(h * w3_ref[...], axis=-1, keepdims=True) + b3_ref[...]
    o_ref[...] = s.astype(o_ref.dtype)


def prepare_params(params):
    """One-time conversion of torch-style params into kernel-ready buffers."""
    w1, b1, w2, b2, w3, b3 = params
    return (
        w1.astype(jnp.bfloat16),                       # (256, 256) bf16
        b1.reshape(1, HIDDEN).astype(jnp.float32),     # (1, 256)
        w2.astype(jnp.bfloat16),                       # (256, 256) bf16
        b2.reshape(1, HIDDEN).astype(jnp.float32),     # (1, 256)
        w3.reshape(1, HIDDEN).astype(jnp.float32),     # (1, 256) row
        b3.reshape(1, 1).astype(jnp.float32),          # (1, 1)
    )


def mlp_forward(x, prepared, *, tile_m=256):
    """x: (N, 256) float32, N a multiple of 4. Returns (N//4, 4) float32."""
    w1b, b1r, w2b, b2r, w3r, b3r = prepared
    N = x.shape[0]
    tile_m = min(tile_m, N)
    assert N % 4 == 0 and N % tile_m == 0 and tile_m % 8 == 0

    flops = N * (4 * HIDDEN * HIDDEN + 6 * HIDDEN)
    bytes_accessed = (N * HIDDEN * 4            # x (f32 in)
                      + 2 * HIDDEN * HIDDEN * 2  # w1, w2 (bf16)
                      + 3 * HIDDEN * 4 + 4       # b1, b2, w3 row, b3
                      + N * 4)                   # output

    out = pl.pallas_call(
        mlp_kernel,
        out_shape=jax.ShapeDtypeStruct((N, 1), jnp.float32),
        grid_spec=pltpu.PrefetchScalarGridSpec(
            num_scalar_prefetch=0,
            grid=(N // tile_m,),
            in_specs=[
                pl.BlockSpec((tile_m, HIDDEN), lambda i: (i, 0)),  # x tile
                pl.BlockSpec((HIDDEN, HIDDEN), lambda i: (0, 0)),  # w1 (bf16)
                pl.BlockSpec((1, HIDDEN), lambda i: (0, 0)),       # b1
                pl.BlockSpec((HIDDEN, HIDDEN), lambda i: (0, 0)),  # w2 (bf16)
                pl.BlockSpec((1, HIDDEN), lambda i: (0, 0)),       # b2
                pl.BlockSpec((1, HIDDEN), lambda i: (0, 0)),       # w3 row
                pl.BlockSpec((1, 1), lambda i: (0, 0)),            # b3
            ],
            out_specs=pl.BlockSpec((tile_m, 1), lambda i: (i, 0)),
        ),
        compiler_params=pltpu.CompilerParams(
            dimension_semantics=("parallel",)),
        cost_estimate=pl.CostEstimate(
            flops=flops, transcendentals=0, bytes_accessed=bytes_accessed),
    )(x, w1b, b1r, w2b, b2r, w3r, b3r)

    # torch's .view(-1, 4): reshape of the dense (N, 1) result, layout-free.
    return out.reshape(-1, 4)


def init_params(key):
    """Deterministic init mimicking nn.Linear default (uniform +/- 1/sqrt(fan_in))."""
    k1, k2, k3, k4, k5, k6 = jax.random.split(key, 6)
    bound = 1.0 / jnp.sqrt(jnp.float32(HIDDEN))
    # stored as (in_features, out_features), i.e. torch weight transposed
    w1 = jax.random.uniform(k1, (HIDDEN, HIDDEN), jnp.float32, -bound, bound)
    b1 = jax.random.uniform(k2, (HIDDEN,), jnp.float32, -bound, bound)
    w2 = jax.random.uniform(k3, (HIDDEN, HIDDEN), jnp.float32, -bound, bound)
    b2 = jax.random.uniform(k4, (HIDDEN,), jnp.float32, -bound, bound)
    w3 = jax.random.uniform(k5, (HIDDEN, 1), jnp.float32, -bound, bound)
    b3 = jax.random.uniform(k6, (1,), jnp.float32, -bound, bound)
    return w1, b1, w2, b2, w3, b3


if __name__ == "__main__":
    key = jax.random.PRNGKey(0)
    pkey, xkey = jax.random.split(key)
    params = init_params(pkey)
    prepared = prepare_params(params)
    w1, b1, w2, b2, w3, b3 = params

    # Small-batch path (tile_m clamps to 8) and a multi-tile path
    # (2 grid steps at tile_m=256 -> both v7x TensorCores active).
    for N in (8, 512):
        x = jax.random.normal(jax.random.fold_in(xkey, N), (N, HIDDEN), jnp.float32)
        out = jax.block_until_ready(mlp_forward(x, prepared))
        assert out.shape == (N // 4, 4)

        # Reference 1: precision-matched (bf16 operands, f32 accumulation).
        h = jnp.maximum(
            jnp.dot(x.astype(jnp.bfloat16), w1.astype(jnp.bfloat16),
                    preferred_element_type=jnp.float32) + b1, 0.0)
        h = jnp.maximum(
            jnp.dot(h.astype(jnp.bfloat16), w2.astype(jnp.bfloat16),
                    preferred_element_type=jnp.float32) + b2, 0.0)
        ref = (jnp.sum(h * w3.reshape(1, HIDDEN), axis=-1, keepdims=True)
               + b3.reshape(1, 1)).reshape(-1, 4)
        assert jnp.allclose(out, ref, atol=2e-3, rtol=2e-3), "mismatch vs bf16-matched ref"

        # Reference 2: full-f32 semantics of the torch module (loose tolerance
        # to allow bf16 operand quantization in the kernel).
        hf = jnp.maximum(x @ w1 + b1, 0.0)
        hf = jnp.maximum(hf @ w2 + b2, 0.0)
        ref_f32 = (hf @ w3 + b3).reshape(-1, 4)
        assert jnp.allclose(out, ref_f32, atol=5e-2, rtol=5e-2), "mismatch vs f32 ref"

    print("KERNEL_OK")
</pallas_src>

<mosaic_0001>
module attributes {stable_mosaic.version = 11 : i64} {
  func.func @mlp_kernel(%arg0: i32, %arg1: memref<8x256xf32, #tpu.memory_space<vmem>>, %arg2: memref<256x256xbf16, #tpu.memory_space<vmem>>, %arg3: memref<1x256xf32, #tpu.memory_space<vmem>>, %arg4: memref<256x256xbf16, #tpu.memory_space<vmem>>, %arg5: memref<1x256xf32, #tpu.memory_space<vmem>>, %arg6: memref<1x256xf32, #tpu.memory_space<vmem>>, %arg7: memref<1x1xf32, #tpu.memory_space<vmem>>, %arg8: memref<8x1xf32, #tpu.memory_space<vmem>>) attributes {dimension_semantics = [#tpu.dimension_semantics<parallel>], iteration_bounds = array<i64: 1>, scalar_prefetch = 0 : i64, scratch_operands = 0 : i64, tpu.core_type = #tpu.core_type<tc>, window_params = [{transform_indices = @transform_0, window_bounds = array<i64: 8, 256>}, {pipeline_mode = #tpu.pipeline_mode<synchronous>, transform_indices = @transform_1, window_bounds = array<i64: 256, 256>}, {pipeline_mode = #tpu.pipeline_mode<synchronous>, transform_indices = @transform_2, window_bounds = array<i64: 1, 256>}, {pipeline_mode = #tpu.pipeline_mode<synchronous>, transform_indices = @transform_3, window_bounds = array<i64: 256, 256>}, {pipeline_mode = #tpu.pipeline_mode<synchronous>, transform_indices = @transform_4, window_bounds = array<i64: 1, 256>}, {pipeline_mode = #tpu.pipeline_mode<synchronous>, transform_indices = @transform_5, window_bounds = array<i64: 1, 256>}, {pipeline_mode = #tpu.pipeline_mode<synchronous>, transform_indices = @transform_6, window_bounds = array<i64: 1, 1>}, {transform_indices = @transform_7, window_bounds = array<i64: 8, 1>}]} {
    %c0 = arith.constant 0 : index
    %c0_0 = arith.constant 0 : index
    %0 = vector.load %arg1[%c0, %c0_0] : memref<8x256xf32, #tpu.memory_space<vmem>>, vector<8x256xf32>
    %1 = arith.truncf %0 : vector<8x256xf32> to vector<8x256xbf16>
    %c0_1 = arith.constant 0 : index
    %c0_2 = arith.constant 0 : index
    %2 = vector.load %arg2[%c0_1, %c0_2] : memref<256x256xbf16, #tpu.memory_space<vmem>>, vector<256x256xbf16>
    %cst = arith.constant dense<0.000000e+00> : vector<8x256xf32>
    %3 = tpu.matmul %1, %2, %cst {dimension_numbers = #tpu.dot_dimension_numbers<[1], [0], [0], [1], [0, 0, 1, 1], [], []>} : vector<8x256xbf16>, vector<256x256xbf16>, vector<8x256xf32> -> vector<8x256xf32>
    %c0_3 = arith.constant 0 : index
    %c0_4 = arith.constant 0 : index
    %4 = vector.load %arg3[%c0_3, %c0_4] : memref<1x256xf32, #tpu.memory_space<vmem>>, vector<1x256xf32>
    %5 = vector.broadcast %4 : vector<1x256xf32> to vector<8x256xf32>
    %6 = arith.addf %3, %5 : vector<8x256xf32>
    %cst_5 = arith.constant 0.000000e+00 : f32
    %7 = vector.broadcast %cst_5 : f32 to vector<8x256xf32>
    %8 = arith.maximumf %6, %7 : vector<8x256xf32>
    %9 = arith.truncf %8 : vector<8x256xf32> to vector<8x256xbf16>
    %c0_6 = arith.constant 0 : index
    %c0_7 = arith.constant 0 : index
    %10 = vector.load %arg4[%c0_6, %c0_7] : memref<256x256xbf16, #tpu.memory_space<vmem>>, vector<256x256xbf16>
    %cst_8 = arith.constant dense<0.000000e+00> : vector<8x256xf32>
    %11 = tpu.matmul %9, %10, %cst_8 {dimension_numbers = #tpu.dot_dimension_numbers<[1], [0], [0], [1], [0, 0, 1, 1], [], []>} : vector<8x256xbf16>, vector<256x256xbf16>, vector<8x256xf32> -> vector<8x256xf32>
    %c0_9 = arith.constant 0 : index
    %c0_10 = arith.constant 0 : index
    %12 = vector.load %arg5[%c0_9, %c0_10] : memref<1x256xf32, #tpu.memory_space<vmem>>, vector<1x256xf32>
    %13 = vector.broadcast %12 : vector<1x256xf32> to vector<8x256xf32>
    %14 = arith.addf %11, %13 : vector<8x256xf32>
    %cst_11 = arith.constant 0.000000e+00 : f32
    %15 = vector.broadcast %cst_11 : f32 to vector<8x256xf32>
    %16 = arith.maximumf %14, %15 : vector<8x256xf32>
    %c0_12 = arith.constant 0 : index
    %c0_13 = arith.constant 0 : index
    %17 = vector.load %arg6[%c0_12, %c0_13] : memref<1x256xf32, #tpu.memory_space<vmem>>, vector<1x256xf32>
    %18 = vector.broadcast %17 : vector<1x256xf32> to vector<8x256xf32>
    %19 = arith.mulf %16, %18 : vector<8x256xf32>
    %cst_14 = arith.constant dense<0.000000e+00> : vector<8xf32>
    %20 = vector.multi_reduction <add>, %19, %cst_14 [1] : vector<8x256xf32> to vector<8xf32>
    %21 = vector.shape_cast %20 : vector<8xf32> to vector<8x1xf32>
    %c0_15 = arith.constant 0 : index
    %c0_16 = arith.constant 0 : index
    %22 = vector.load %arg7[%c0_15, %c0_16] : memref<1x1xf32, #tpu.memory_space<vmem>>, vector<1x1xf32>
    %23 = vector.broadcast %22 : vector<1x1xf32> to vector<8x1xf32>
    %24 = arith.addf %21, %23 : vector<8x1xf32>
    %c0_17 = arith.constant 0 : index
    %c0_18 = arith.constant 0 : index
    %25 = vector.load %arg8[%c0_17, %c0_18] : memref<8x1xf32, #tpu.memory_space<vmem>>, vector<8x1xf32>
    tpu.vector_store %arg8[%c0_17, %c0_18], %24 {strides = array<i32>} : memref<8x1xf32, #tpu.memory_space<vmem>>, vector<8x1xf32>,
    return
  }
  func.func @transform_0(%arg0: i32) -> (i32, i32) {
    %c0_i32 = arith.constant 0 : i32
    %c0_i32_0 = arith.constant 0 : i32
    return %arg0, %c0_i32 : i32, i32
  }
  func.func @transform_1(%arg0: i32) -> (i32, i32) {
    %c0_i32 = arith.constant 0 : i32
    %c0_i32_0 = arith.constant 0 : i32
    %c0_i32_1 = arith.constant 0 : i32
    return %c0_i32, %c0_i32_0 : i32, i32
  }
  func.func @transform_2(%arg0: i32) -> (i32, i32) {
    %c0_i32 = arith.constant 0 : i32
    %c0_i32_0 = arith.constant 0 : i32
    %c0_i32_1 = arith.constant 0 : i32
    return %c0_i32, %c0_i32_0 : i32, i32
  }
  func.func @transform_3(%arg0: i32) -> (i32, i32) {
    %c0_i32 = arith.constant 0 : i32
    %c0_i32_0 = arith.constant 0 : i32
    %c0_i32_1 = arith.constant 0 : i32
    return %c0_i32, %c0_i32_0 : i32, i32
  }
  func.func @transform_4(%arg0: i32) -> (i32, i32) {
    %c0_i32 = arith.constant 0 : i32
    %c0_i32_0 = arith.constant 0 : i32
    %c0_i32_1 = arith.constant 0 : i32
    return %c0_i32, %c0_i32_0 : i32, i32
  }
  func.func @transform_5(%arg0: i32) -> (i32, i32) {
    %c0_i32 = arith.constant 0 : i32
    %c0_i32_0 = arith.constant 0 : i32
    %c0_i32_1 = arith.constant 0 : i32
    return %c0_i32, %c0_i32_0 : i32, i32
  }
  func.func @transform_6(%arg0: i32) -> (i32, i32) {
    %c0_i32 = arith.constant 0 : i32
    %c0_i32_0 = arith.constant 0 : i32
    %c0_i32_1 = arith.constant 0 : i32
    return %c0_i32, %c0_i32_0 : i32, i32
  }
  func.func @transform_7(%arg0: i32) -> (i32, i32) {
    %c0_i32 = arith.constant 0 : i32
    %c0_i32_0 = arith.constant 0 : i32
    return %arg0, %c0_i32 : i32, i32
  }
}

</mosaic_0001>

<bundles_post_ra>
// kernel: tpu_custom_call.1
= control target key start
LH: loop header
LB: loop body
LE: loop exit
PB: predicated region body
PF: predicated region fallthrough
CT: control target
= control target key end

     0   :  { %s899_s0 = inlined_call_operand.hbm [shape: f32[8,256], index: 0, kind: input, shape index: {}]   ;;  %s900_s1 = inlined_call_operand.hbm [shape: bf16[256,256], index: 1, kind: input, shape index: {}]   ;;  %s901_s2 = inlined_call_operand.vmem [shape: f32[1,256], index: 2, kind: input, shape index: {}]   ;;  %s902_s3 = inlined_call_operand.hbm [shape: bf16[256,256], index: 3, kind: input, shape index: {}]   ;;  %s903_s4 = inlined_call_operand.vmem [shape: f32[1,256], index: 4, kind: input, shape index: {}]   ;;  %s904_s5 = inlined_call_operand.vmem [shape: f32[1,256], index: 5, kind: input, shape index: {}]   ;;  %s905_s6 = inlined_call_operand.<no memory space> [shape: f32[1,1], index: 6, kind: input, shape index: {}]   ;;  %s906_s7 = inlined_call_operand.vmem [shape: f32[8,1], index: 7, kind: output, shape index: {}]  }
   0x1   :  { %v12_v0 = vstv %s905_s6 }
   0x2   :  { %13 = vst [vmem:[#allocation2] sm:$0x1] %v12_v0 }
   0x3   :  { %14 = vsyncpa [#allocation4], 0 }
   0x4   :  { %15 = vsyncpa [#allocation6], 0  ;;  %s830_s26 = smov [#allocation5]  }
   0x5   :  { %s31_s27 = sshll.u32 %s830_s26, 4  ;;  %s32_s27 = int_to_ptr.vmem [resolvable:$true] %s31_s27 }
   0x6   :  { %s774_s28 = scalar_lea.vmem %s32_s27, 4096  ;;  %p779_p1 = scmp.lt.s32.totalorder %s32_s27, %s32_s27 }
   0x7   :  { %p775_p0 = scmp.ne.s32.totalorder %s32_s27, %s774_s28  ;;  %p780_p2 = scmp.lt.s32.totalorder %s774_s28, %s774_s28 }
   0x9   :  { %p781_p3 = por %p780_p2, %p779_p1 }
   0xb   :  { %p782_p4 = pnand %p781_p3, %p775_p0 }
   0xd   :  { %785 = shalt.err (!%p782_p4)
}
   0xe   :  { %s831_s29 = smov 128   ;;  %s832_s30 = smov 8  }
   0xf   :  { %37 = dma.hbm_to_vmem [thread:$0]  %s900_s1, 4096, %s32_s27, [#allocation6], %s831_s29, %s831_s29, %s832_s30  }
  0x10   :  { %s833_s6 = smov [#allocation3]   ;;  %s834_s11 = smov [#allocation7]  }
  0x11   :  { %s22_s10 = sshll.u32 %s833_s6, 4  ;;  %s45_s12 = sshll.u32 %s834_s11, 4  ;;  %s23_s10 = int_to_ptr.vmem [resolvable:$true] %s22_s10  ;;  %s46_s12 = int_to_ptr.vmem [resolvable:$true] %s45_s12 }
  0x12   :  { %s794_s13 = scalar_lea.vmem %s23_s10, 256  ;;  %p799_p6 = scmp.lt.s32.totalorder %s23_s10, %s23_s10 }
  0x13   :  { %p795_p5 = scmp.ne.s32.totalorder %s23_s10, %s794_s13  ;;  %p800_p7 = scmp.lt.s32.totalorder %s794_s13, %s794_s13 }
  0x15   :  { %p801_p8 = por %p800_p7, %p799_p6 }
  0x17   :  { %p802_p9 = pnand %p801_p8, %p795_p5 }
  0x19   :  { %805 = shalt.err (!%p802_p9)
}
  0x1a   :  { %25 = dma.hbm_to_vmem [thread:$0]  %s899_s0, 256, %s23_s10, [#allocation4]  }
  0x1b   :  { %s814_s16 = scalar_lea.vmem %s46_s12, 4096  ;;  %p819_p11 = scmp.lt.s32.totalorder %s46_s12, %s46_s12 }
  0x1c   :  { %p815_p10 = scmp.ne.s32.totalorder %s46_s12, %s814_s16  ;;  %p820_p12 = scmp.lt.s32.totalorder %s814_s16, %s814_s16 }
  0x1e   :  { %p821_p13 = por %p820_p12, %p819_p11 }
  0x20   :  { %p822_p0 = pnand %p821_p13, %p815_p10 }
  0x22   :  { %825 = shalt.err (!%p822_p0)
}
  0x23   :  { %51 = dma.hbm_to_vmem [thread:$0]  %s902_s3, 4096, %s46_s12, [#allocation6], %s831_s29, %s831_s29, %s832_s30  }
  0x24   :  { %826 = dma.done.wait [#allocation4], 256  }
  0x25   :  { %827 = vsyncadd [#allocation4], 4294967040 }
  0x26   :  { %828 = dma.done.wait [#allocation6], 8192  }
  0x27   :  { %829 = vsyncadd [#allocation6], 4294959104  ;;  %v670_v1 = vld [vmem:[#allocation5 + $0x74] ss:$8 sps:$4 sm:$0xff]   ;;  %v672_v2 = vld [vmem:[#allocation5 + $0x70] ss:$8 sps:$4 sm:$0xff]  }
  0x28   :  { %275 = vmatprep.subr.bf16.mxu0 %v670_v1  ;;  %v673_v3 = vld [vmem:[#allocation5 + $0x64] ss:$8 sps:$4 sm:$0xff]   ;;  %v675_v4 = vld [vmem:[#allocation5 + $0x60] ss:$8 sps:$4 sm:$0xff]   ;;  %v676_v5 = vld [vmem:[#allocation5 + $0x54] ss:$8 sps:$4 sm:$0xff]  }
  0x29   :  { %276 = vmatpush1.bf16.msra.mxu0 %v672_v2  ;;  %v678_v6 = vld [vmem:[#allocation5 + $0x50] ss:$8 sps:$4 sm:$0xff]   ;;  %v679_v7 = vld [vmem:[#allocation5 + $0x44] ss:$8 sps:$4 sm:$0xff]   ;;  %v681_v8 = vld [vmem:[#allocation5 + $0x40] ss:$8 sps:$4 sm:$0xff]  }
  0x2a   :  { %277 = vmatprep.subr.bf16.mxu0 %v673_v3  ;;  %v682_v9 = vld [vmem:[#allocation5 + $0x34] ss:$8 sps:$4 sm:$0xff]   ;;  %v684_v10 = vld [vmem:[#allocation5 + $0x30] ss:$8 sps:$4 sm:$0xff]   ;;  %v685_v11 = vld [vmem:[#allocation5 + $0x24] ss:$8 sps:$4 sm:$0xff]  }
  0x2b   :  { %v687_v12 = vld [vmem:[#allocation5 + $0x20] ss:$8 sps:$4 sm:$0xff]   ;;  %v688_v13 = vld [vmem:[#allocation5 + $0x14] ss:$8 sps:$4 sm:$0xff]   ;;  %v690_v14 = vld [vmem:[#allocation5 + $0x10] ss:$8 sps:$4 sm:$0xff]  }
  0x2c   :  { %v68_v15 = vld [vmem:[#allocation3 + $0x8] sm:$0xff]  ;;  %v691_v19 = vld [vmem:[#allocation5 + $0x4] ss:$8 sps:$4 sm:$0xff]   ;;  %v693_v21 = vld [vmem:[#allocation5] ss:$8 sps:$4 sm:$0xff]   ;;  %vm592_vm0 = vcmask 7168  }
  0x2d   :  { %278 = vmatpush1.bf16.msra.mxu0 %v675_v4  ;;  %v70_v16 = vpack.c.bf16 %v68_v15, %v68_v15  ;;  %v718_v17 = vld [vmem:[#allocation7 + $0x74] ss:$8 sps:$4 sm:$0xff]   ;;  %v720_v18 = vld [vmem:[#allocation7 + $0x70] ss:$8 sps:$4 sm:$0xff]   ;;  %v721_v20 = vld [vmem:[#allocation7 + $0x64] ss:$8 sps:$4 sm:$0xff]  }
  0x2e   :  { %279 = vmatprep.subr.bf16.mxu0 %v676_v5  ;;  %524 = vmatprep.subr.bf16.mxu1 %v718_v17  ;;  %v723_v22 = vld [vmem:[#allocation7 + $0x60] ss:$8 sps:$4 sm:$0xff]   ;;  %v724_v23 = vld [vmem:[#allocation7 + $0x54] ss:$8 sps:$4 sm:$0xff]   ;;  %v696_v25 = vld [vmem:[#allocation5 + $0xf0] ss:$8 sps:$4 sm:$0xff]   ;;  %v105_v5 = vlaneseq }
  0x2f   :  { %307 = vmatprep.mubr.bf16.mxu0 %v70_v16  ;;  %525 = vmatpush1.bf16.msra.mxu1 %v720_v18  ;;  %v694_v24 = vld [vmem:[#allocation5 + $0xf4] ss:$8 sps:$4 sm:$0xff]   ;;  %v726_v26 = vld [vmem:[#allocation7 + $0x50] ss:$8 sps:$4 sm:$0xff]   ;;  %v727_v27 = vld [vmem:[#allocation7 + $0x44] ss:$8 sps:$4 sm:$0xff]  }
  0x30   :  { %526 = vmatprep.subr.bf16.mxu1 %v721_v20  ;;  %v697_v28 = vld [vmem:[#allocation5 + $0xe4] ss:$8 sps:$4 sm:$0xff]   ;;  %v699_v29 = vld [vmem:[#allocation5 + $0xe0] ss:$8 sps:$4 sm:$0xff]   ;;  %v730_v31 = vld [vmem:[#allocation7 + $0x34] ss:$8 sps:$4 sm:$0xff]  }
  0x31   :  { %280 = vmatpush1.bf16.msra.mxu0 %v678_v6  ;;  %v729_v30 = vld [vmem:[#allocation7 + $0x40] ss:$8 sps:$4 sm:$0xff]   ;;  %v700_v32 = vld [vmem:[#allocation5 + $0xd4] ss:$8 sps:$4 sm:$0xff]   ;;  %v702_v33 = vld [vmem:[#allocation5 + $0xd0] ss:$8 sps:$4 sm:$0xff]  }
  0x32   :  { %281 = vmatprep.subr.bf16.mxu0 %v679_v7  ;;  %v732_v34 = vld [vmem:[#allocation7 + $0x30] ss:$8 sps:$4 sm:$0xff]   ;;  %v733_v35 = vld [vmem:[#allocation7 + $0x24] ss:$8 sps:$4 sm:$0xff]   ;;  %v735_v37 = vld [vmem:[#allocation7 + $0x20] ss:$8 sps:$4 sm:$0xff]  }
  0x33   :  { %527 = vmatpush1.bf16.msra.mxu1 %v723_v22  ;;  %v703_v36 = vld [vmem:[#allocation5 + $0xc4] ss:$8 sps:$4 sm:$0xff]   ;;  %v705_v38 = vld [vmem:[#allocation5 + $0xc0] ss:$8 sps:$4 sm:$0xff]   ;;  %v736_v39 = vld [vmem:[#allocation7 + $0x14] ss:$8 sps:$4 sm:$0xff]  }
  0x34   :  { %528 = vmatprep.subr.bf16.mxu1 %v724_v23  ;;  %v706_v40 = vld [vmem:[#allocation5 + $0xb4] ss:$8 sps:$4 sm:$0xff]   ;;  %v738_v41 = vld [vmem:[#allocation7 + $0x10] ss:$8 sps:$4 sm:$0xff]   ;;  %v739_v43 = vld [vmem:[#allocation7 + $0x4] ss:$8 sps:$4 sm:$0xff]  }
  0x35   :  { %282 = vmatpush1.bf16.msra.mxu0 %v681_v8  ;;  %v708_v42 = vld [vmem:[#allocation5 + $0xb0] ss:$8 sps:$4 sm:$0xff]   ;;  %v709_v44 = vld [vmem:[#allocation5 + $0xa4] ss:$8 sps:$4 sm:$0xff]   ;;  %v741_v45 = vld [vmem:[#allocation7] ss:$8 sps:$4 sm:$0xff]  }
  0x36   :  { %283 = vmatprep.subr.bf16.mxu0 %v682_v9  ;;  %v711_v46 = vld [vmem:[#allocation5 + $0xa0] ss:$8 sps:$4 sm:$0xff]   ;;  %v742_v47 = vld [vmem:[#allocation7 + $0xf4] ss:$8 sps:$4 sm:$0xff]   ;;  %v744_v49 = vld [vmem:[#allocation7 + $0xf0] ss:$8 sps:$4 sm:$0xff]  }
  0x37   :  { %529 = vmatpush1.bf16.msra.mxu1 %v726_v26  ;;  %v712_v48 = vld [vmem:[#allocation5 + $0x94] ss:$8 sps:$4 sm:$0xff]   ;;  %v714_v50 = vld [vmem:[#allocation5 + $0x90] ss:$8 sps:$4 sm:$0xff]   ;;  %v745_v51 = vld [vmem:[#allocation7 + $0xe4] ss:$8 sps:$4 sm:$0xff]  }
  0x38   :  { %530 = vmatprep.subr.bf16.mxu1 %v727_v27  ;;  %v715_v52 = vld [vmem:[#allocation5 + $0x84] ss:$8 sps:$4 sm:$0xff]   ;;  %v747_v53 = vld [vmem:[#allocation7 + $0xe0] ss:$8 sps:$4 sm:$0xff]   ;;  %v67_v55 = vld [vmem:[#allocation3] sm:$0xff]  ;;  %v106_v6 = vshrl.u32 %v105_v5, 7 }
  0x39   :  { %284 = vmatpush1.bf16.msra.mxu0 %v684_v10  ;;  %v717_v54 = vld [vmem:[#allocation5 + $0x80] ss:$8 sps:$4 sm:$0xff]   ;;  %v748_v56 = vld [vmem:[#allocation7 + $0xd4] ss:$8 sps:$4 sm:$0xff]   ;;  %v69_v57 = vpack.c.bf16 %v67_v55, %v67_v55  ;;  %v750_v58 = vld [vmem:[#allocation7 + $0xd0] ss:$8 sps:$4 sm:$0xff]  }
  0x3a   :  { %285 = vmatprep.subr.bf16.mxu0 %v685_v11  ;;  %v751_v59 = vld [vmem:[#allocation7 + $0xc4] ss:$8 sps:$4 sm:$0xff]   ;;  %v753_v60 = vld [vmem:[#allocation7 + $0xc0] ss:$8 sps:$4 sm:$0xff]   ;;  %v754_v61 = vld [vmem:[#allocation7 + $0xb4] ss:$8 sps:$4 sm:$0xff]  }
  0x3b   :  { %531 = vmatpush1.bf16.msra.mxu1 %v729_v30  ;;  %v756_v62 = vld [vmem:[#allocation7 + $0xb0] ss:$8 sps:$4 sm:$0xff]   ;;  %v757_v63 = vld [vmem:[#allocation7 + $0xa4] ss:$8 sps:$4 sm:$0xff]   ;;  %v759_v0 = vld [vmem:[#allocation7 + $0xa0] ss:$8 sps:$4 sm:$0xff]  }
  0x3c   :  { %532 = vmatprep.subr.bf16.mxu1 %v730_v31  ;;  %v760_v1 = vld [vmem:[#allocation7 + $0x94] ss:$8 sps:$4 sm:$0xff]   ;;  %v762_v2 = vld [vmem:[#allocation7 + $0x90] ss:$8 sps:$4 sm:$0xff]   ;;  %v763_v3 = vld [vmem:[#allocation7 + $0x84] ss:$8 sps:$4 sm:$0xff]  }
  0x3d   :  { %286 = vmatpush1.bf16.msra.mxu0 %v687_v12  ;;  %v765_v4 = vld [vmem:[#allocation7 + $0x80] ss:$8 sps:$4 sm:$0xff]   ;;  %v107_v7 = vsub.s32 0, %v106_v6  ;;  %v103_v8 = vld [vmem:[%s901_s2] sm:$0x3]  ;;  %v111_v9 = vsub.s32 1, %v106_v6 }
  0x3e   :  { %287 = vmatprep.subr.bf16.mxu0 %v688_v13  ;;  %v352_v22 = vld [vmem:[%s903_s4] sm:$0x3] }
  0x3f   :  { %533 = vmatpush1.bf16.msra.mxu1 %v732_v34  ;;  %v108_v10 = vrot.slane %v103_v8, %v107_v7  ;;  %v112_v11 = vrot.slane %v103_v8, %v111_v9  ;;  %v357_v23 = vrot.slane %v352_v22, %v107_v7  ;;  %v567_v26 = vld [vmem:[%s904_s5] sm:$0x3] }
  0x40   :  { %534 = vmatprep.subr.bf16.mxu1 %v733_v35  ;;  %v572_v31 = vrot.slane %v567_v26, %v107_v7 }
  0x41   :  { %288 = vmatpush1.bf16.msra.mxu0 %v690_v14 }
  0x42   :  { %289 = vmatprep.subr.bf16.mxu0 %v691_v19 }
  0x43   :  { %535 = vmatpush1.bf16.msra.mxu1 %v735_v37 }
  0x44   :  { %536 = vmatprep.subr.bf16.mxu1 %v736_v39  ;;  %v664_v39 = vld [vmem:[#allocation2] ss:$0 sm:$0xff] }
  0x45   :  { %290 = vmatpush1.bf16.msra.mxu0 %v693_v21 }
  0x46   :  { %291 = vmatprep.subr.bf16.mxu0 %v694_v24  ;;  %v361_v24 = vrot.slane %v352_v22, %v111_v9 }
  0x47   :  { %537 = vmatpush1.bf16.msra.mxu1 %v738_v41 }
  0x48   :  { %538 = vmatprep.subr.bf16.mxu1 %v739_v43 }
  0x49   :  { %292 = vmatpush2.bf16.msra.mxu0 %v696_v25 }
  0x4a   :  { %293 = vmatprep.subr.bf16.mxu0 %v697_v28 }
  0x4b   :  { %539 = vmatpush1.bf16.msra.mxu1 %v741_v45 }
  0x4c   :  { %540 = vmatprep.subr.bf16.mxu1 %v742_v47 }
  0x4d   :  { %294 = vmatpush2.bf16.msra.mxu0 %v699_v29 }
  0x4e   :  { %295 = vmatprep.subr.bf16.mxu0 %v700_v32  ;;  %v576_v32 = vrot.slane %v567_v26, %v111_v9 }
  0x4f   :  { %541 = vmatpush2.bf16.msra.mxu1 %v744_v49 }
  0x50   :  { %542 = vmatprep.subr.bf16.mxu1 %v745_v51 }
  0x51   :  { %296 = vmatpush2.bf16.msra.mxu0 %v702_v33 }
  0x52   :  { %297 = vmatprep.subr.bf16.mxu0 %v703_v36 }
  0x53   :  { %543 = vmatpush2.bf16.msra.mxu1 %v747_v53 }
  0x54   :  { %544 = vmatprep.subr.bf16.mxu1 %v748_v56 }
  0x55   :  { %298 = vmatpush2.bf16.msra.mxu0 %v705_v38 }
  0x56   :  { %299 = vmatprep.subr.bf16.mxu0 %v706_v40 }
  0x57   :  { %545 = vmatpush2.bf16.msra.mxu1 %v750_v58 }
  0x58   :  { %546 = vmatprep.subr.bf16.mxu1 %v751_v59 }
  0x59   :  { %300 = vmatpush2.bf16.msra.mxu0 %v708_v42 }
  0x5a   :  { %301 = vmatprep.subr.bf16.mxu0 %v709_v44 }
  0x5b   :  { %547 = vmatpush2.bf16.msra.mxu1 %v753_v60 }
  0x5c   :  { %548 = vmatprep.subr.bf16.mxu1 %v754_v61 }
  0x5d   :  { %302 = vmatpush2.bf16.msra.mxu0 %v711_v46 }
  0x5e   :  { %303 = vmatprep.subr.bf16.mxu0 %v712_v48 }
  0x5f   :  { %549 = vmatpush2.bf16.msra.mxu1 %v756_v62 }
  0x60   :  { %550 = vmatprep.subr.bf16.mxu1 %v757_v63 }
  0x61   :  { %304 = vmatpush2.bf16.msra.mxu0 %v714_v50 }
  0x62   :  { %305 = vmatprep.subr.bf16.mxu0 %v715_v52 }
  0x63   :  { %551 = vmatpush2.bf16.msra.mxu1 %v759_v0 }
  0x64   :  { %552 = vmatprep.subr.bf16.mxu1 %v760_v1 }
  0x65   :  { %306 = vmatpush2.bf16.msra.mxu0 %v717_v54 }
  0x67   :  { %553 = vmatpush2.bf16.msra.mxu1 %v762_v2 }
  0x68   :  { %308 = vmatmul.mubr.bf16.vlgmr.msra.gmra.mxu0 %v69_v57  ;;  %554 = vmatprep.subr.bf16.mxu1 %v763_v3 }
  0x6b   :  { %555 = vmatpush2.bf16.msra.mxu1 %v765_v4 }
 0x128   :  { %v309_v12 = vpop.f32.mrf.mxu0 }
 0x129   :  { %v310_v13 = vadd.f32 %v309_v12, %v108_v10 }
 0x12a   :  { %v311_v14 = vpop.f32.mrf.mxu0 }
 0x12b   :  { %v312_v15 = vadd.f32 %v311_v14, %v112_v11  ;;  %v316_v16 = vmax.f32 %v310_v13, 0.0 }
 0x12c   :  { %v313_v17 = vpop.f32.mrf.mxu0 }
 0x12d   :  { %v317_v18 = vmax.f32 %v312_v15, 0.0  ;;  %v318_v21 = vpack.c.bf16 %v316_v16, %v316_v16 }
 0x12e   :  { %v314_v19 = vpop.f32.mrf.mxu0 }
 0x12f   :  { %v319_v20 = vpack.c.bf16 %v317_v18, %v317_v18 }
 0x131   :  { %556 = vmatprep.mubr.bf16.mxu1 %v319_v20 }
 0x132   :  { %557 = vmatmul.mubr.bf16.vlgmr.msra.gmra.mxu1 %v318_v21 }
 0x1f2   :  { %v558_v25 = vpop.f32.mrf.mxu1 }
 0x1f3   :  { %v559_v27 = vadd.f32 %v558_v25, %v357_v23 }
 0x1f4   :  { %v560_v28 = vpop.f32.mrf.mxu1 }
 0x1f5   :  { %v565_v29 = vmax.f32 %v559_v27, 0.0  ;;  %v561_v30 = vadd.f32 %v560_v28, %v361_v24 }
 0x1f6   :  { %v562_v33 = vpop.f32.mrf.mxu1 }
 0x1f7   :  { %v566_v34 = vmax.f32 %v561_v30, 0.0  ;;  %v579_v36 = vmul.f32 %v572_v31, %v565_v29 }
 0x1f8   :  { %v563_v35 = vpop.f32.mrf.mxu1 }
 0x1f9   :  { %v580_v37 = vmul.f32 %v576_v32, %v566_v34 }
 0x1fb   :  { %v581_v38 = vadd.f32 %v580_v37, %v579_v36 }
 0x1fd   :  { %582 = vadd.xlane.f32.xlu0 %v581_v38 }
 0x286   :  { %v583_v40 = vpop.xlane.xlu0 %582 }
 0x287   :  { %v591_v41 = vadd.f32 %v664_v39, %v583_v40 }
 0x289   :  { %593 = vst.msk [vmem:[%s906_s7] sm:$0xff] %vm592_vm0, %v591_v41 }
 0x28a   :  { %598 = vsyncpa [#allocation4], 1 }
 0x28b   :  { %599 = vsyncpa [#allocation6], 1 }

</bundles_post_ra>
